<compile_context>
chip_gen: v5e
topology: v5e:2x2
jax: 0.10.0
libtpu: 0.0.40
codegen_flags: <defaults>
</compile_context>

<pallas_src>
import functools
import math

import jax
import jax.numpy as jnp
from jax import lax
from jax.experimental import pallas as pl
from jax.experimental.pallas import tpu as pltpu


def _round_up(x: int, m: int) -> int:
    return ((x + m - 1) // m) * m


def _cdiv(a: int, b: int) -> int:
    return -(-a // b)


# ----------------------------------------------------------------------------- kernel


def _ff_kernel(x_ref, gamma_ref, beta_ref,
               w1v_ref, w1g_ref, b1v_ref, b1g_ref,
               w2_ref, b2_ref,
               o_ref, *scratch,
               d_real: int, needs_mask: bool, nj: int):
    # grid = (row tiles [parallel], hidden tiles [arbitrary / reduction, innermost])
    j = pl.program_id(1)
    compute_dtype = w1v_ref.dtype

    def _layernorm():
        x = x_ref[...].astype(jnp.float32)                      # (TM, D_pad)
        inv_d = jnp.float32(1.0 / d_real)
        mean = jnp.sum(x, axis=-1, keepdims=True) * inv_d        # padded cols are 0
        centered = x - mean
        if needs_mask:                                           # only when D != D_pad
            col = lax.broadcasted_iota(jnp.int32, x.shape, 1)
            centered = jnp.where(col < d_real, centered, 0.0)
        var = jnp.sum(centered * centered, axis=-1, keepdims=True) * inv_d
        xn = centered * lax.rsqrt(var + jnp.float32(1e-5))
        xn = xn * gamma_ref[...].astype(jnp.float32) + beta_ref[...].astype(jnp.float32)
        return xn.astype(compute_dtype)

    if nj == 1:
        # Hidden dim fully resident: no scratch needed at all.
        xn = _layernorm()
    else:
        xn_ref, acc_ref = scratch

        @pl.when(j == 0)
        def _():
            xn_ref[...] = _layernorm()

        xn = xn_ref[...]                                         # (TM, D_pad), compute dtype

    # --- Linear 1 (value / gate slabs of width TH) ---
    val = jnp.dot(xn, w1v_ref[...], preferred_element_type=jnp.float32) \
        + b1v_ref[...].astype(jnp.float32)                       # (TM, TH) f32
    gate = jnp.dot(xn, w1g_ref[...], preferred_element_type=jnp.float32) \
        + b1g_ref[...].astype(jnp.float32)                       # (TM, TH) f32

    # --- GEGLU: exact GELU (matches PyTorch F.gelu default) ---
    gelu_g = 0.5 * gate * (1.0 + lax.erf(gate * jnp.float32(0.7071067811865476)))
    h = (val * gelu_g).astype(w2_ref.dtype)                      # (TM, TH) weight dtype

    # --- Linear 2 partial product ---
    part = jnp.dot(h, w2_ref[...], preferred_element_type=jnp.float32)

    if nj == 1:
        o_ref[...] = (part + b2_ref[...].astype(jnp.float32)).astype(o_ref.dtype)
    else:
        @pl.when(j == 0)
        def _():
            acc_ref[...] = part                                  # direct store, no zero-init

        @pl.when(j > 0)
        def _():
            acc_ref[...] += part

        @pl.when(j == nj - 1)
        def _():
            o_ref[...] = (acc_ref[...] + b2_ref[...].astype(jnp.float32)).astype(o_ref.dtype)


# ----------------------------------------------------------------------------- tiling


def _default_tiles_and_budget():
    """Generation-aware (tm, th, vmem budget) defaults."""
    kind = ""
    try:
        kind = jax.devices()[0].device_kind.lower()
    except Exception:
        pass
    if "v7" in kind:
        # 64 MiB physical VMEM, 2 TCs: smaller tiles, tight budget.
        return 512, 256, 40 * 1024 * 1024
    if "v6" in kind:
        return 768, 512, 88 * 1024 * 1024
    if "v5" in kind:
        return 384, 512, 80 * 1024 * 1024
    return 512, 512, 44 * 1024 * 1024


def _vmem_footprint(tm, th, nj, d_pad, x_bytes, w_bytes):
    blocks = (tm * d_pad * x_bytes            # x tile
              + 2 * d_pad * 4                 # gamma, beta (f32)
              + 2 * d_pad * th * w_bytes      # w1v, w1g slabs
              + 2 * th * 4                    # b1v, b1g (f32)
              + th * d_pad * w_bytes          # w2 slab
              + d_pad * 4                     # b2 (f32)
              + tm * d_pad * x_bytes)         # out tile
    total = 2 * blocks                        # default double buffering
    if nj > 1:
        total += tm * d_pad * w_bytes         # cached LayerNorm output
        total += tm * d_pad * 4               # f32 accumulator
    return total


def _select_tiles(m, d_pad, h_pad, x_bytes, w_bytes, tm_req, th_req, budget):
    row_align = {4: 8, 2: 16, 1: 32}.get(x_bytes, 8)
    tm = max(row_align, min(tm_req, _round_up(m, row_align)))
    n_tiles = _cdiv(m, tm)
    # Keep >= 2 row tiles when the problem is big enough (v7x has 2 TCs sharded
    # over the "parallel" axis); also shrink tm to an even split to avoid dead rows.
    if n_tiles < 2 and m >= 512:
        n_tiles = 2
    tm = _round_up(_cdiv(m, n_tiles), row_align)

    # Fast path: whole hidden dimension resident -> weights DMA'd exactly once.
    if _vmem_footprint(tm, h_pad, 1, d_pad, x_bytes, w_bytes) <= budget:
        return tm, h_pad

    # Otherwise tile the hidden dim with slabs that exactly divide h_pad (no over-pad).
    cand = max(128, (min(th_req, h_pad) // 128) * 128)
    while cand >= 128:
        if h_pad % cand == 0 and \
           _vmem_footprint(tm, cand, h_pad // cand, d_pad, x_bytes, w_bytes) <= budget:
            return tm, cand
        cand -= 128

    # Last resort: shrink the row tile.
    while tm > row_align and \
            _vmem_footprint(tm, 128, h_pad // 128, d_pad, x_bytes, w_bytes) > budget:
        tm = max(row_align, _round_up(tm // 2, row_align))
    return tm, 128


# ----------------------------------------------------------------------------- wrapper


def prepare_feed_forward_params(gamma, beta, w1, b1, w2, b2, *, weight_dtype=None):
    """Pad / split / cast the FeedForward parameters once (hoisted out of forward)."""
    D = gamma.shape[0]
    H = w2.shape[0]
    assert w1.shape == (D, 2 * H) and b1.shape == (2 * H,)
    assert w2.shape == (H, D) and b2.shape == (D,)

    # D padded to match the 256-wide MXU on v6e/v7x (128 is enough for small D);
    # H padded to a lane multiple only (hidden slabs are chosen as exact divisors).
    d_pad = _round_up(D, 128) if D <= 128 else _round_up(D, 256)
    h_pad = _round_up(H, 128)

    wd = jnp.dtype(weight_dtype) if weight_dtype is not None else jnp.dtype(w1.dtype)
    f32 = jnp.float32

    params = dict(
        d=D, h=H, d_pad=d_pad, h_pad=h_pad, weight_dtype=wd,
        gamma=jnp.pad(gamma.astype(f32).reshape(1, D), ((0, 0), (0, d_pad - D))),
        beta=jnp.pad(beta.astype(f32).reshape(1, D), ((0, 0), (0, d_pad - D))),
        w1v=jnp.pad(w1[:, :H].astype(wd), ((0, d_pad - D), (0, h_pad - H))),
        w1g=jnp.pad(w1[:, H:].astype(wd), ((0, d_pad - D), (0, h_pad - H))),
        b1v=jnp.pad(b1[:H].astype(f32).reshape(1, H), ((0, 0), (0, h_pad - H))),
        b1g=jnp.pad(b1[H:].astype(f32).reshape(1, H), ((0, 0), (0, h_pad - H))),
        w2=jnp.pad(w2.astype(wd), ((0, h_pad - H), (0, d_pad - D))),
        b2=jnp.pad(b2.astype(f32).reshape(1, D), ((0, 0), (0, d_pad - D))),
    )
    return params


def feed_forward_pallas(x, params, *, tm=None, th=None, vmem_budget_bytes=None):
    """x: (..., D). Returns (..., D). Matches FeedForward.forward in eval mode."""
    D = params["d"]
    d_pad, h_pad = params["d_pad"], params["h_pad"]
    assert x.shape[-1] == D
    lead = x.shape[:-1]
    M = int(math.prod(lead)) if lead else 1

    tm_def, th_def, budget_def = _default_tiles_and_budget()
    tm_req = tm or tm_def
    th_req = th or th_def
    budget = vmem_budget_bytes or budget_def

    x_bytes = jnp.dtype(x.dtype).itemsize
    w_bytes = jnp.dtype(params["weight_dtype"]).itemsize
    tm_eff, th_eff = _select_tiles(M, d_pad, h_pad, x_bytes, w_bytes,
                                   tm_req, th_req, budget)
    nj = h_pad // th_eff
    M_pad = _round_up(M, tm_eff)

    # Only the activations are padded per call; weights were prepared once.
    x2d = jnp.pad(x.reshape(M, D), ((0, M_pad - M), (0, d_pad - D)))

    kernel = functools.partial(_ff_kernel, d_real=D, needs_mask=(D != d_pad), nj=nj)

    scratch_shapes = []
    if nj > 1:
        scratch_shapes = [
            pltpu.VMEM((tm_eff, d_pad), params["weight_dtype"]),  # cached LayerNorm output
            pltpu.VMEM((tm_eff, d_pad), jnp.float32),             # f32 accumulator
        ]

    footprint = _vmem_footprint(tm_eff, th_eff, nj, d_pad, x_bytes, w_bytes)
    vmem_limit = int(min(100 * 1024 * 1024,
                         max(32 * 1024 * 1024, footprint + 8 * 1024 * 1024)))

    out2d = pl.pallas_call(
        kernel,
        out_shape=jax.ShapeDtypeStruct((M_pad, d_pad), x.dtype),
        grid_spec=pltpu.PrefetchScalarGridSpec(
            num_scalar_prefetch=0,
            grid=(M_pad // tm_eff, nj),
            in_specs=[
                pl.BlockSpec((tm_eff, d_pad), lambda i, j: (i, 0)),   # x rows
                pl.BlockSpec((1, d_pad), lambda i, j: (0, 0)),        # LN gamma
                pl.BlockSpec((1, d_pad), lambda i, j: (0, 0)),        # LN beta
                pl.BlockSpec((d_pad, th_eff), lambda i, j: (0, j)),   # W1 value slab
                pl.BlockSpec((d_pad, th_eff), lambda i, j: (0, j)),   # W1 gate slab
                pl.BlockSpec((1, th_eff), lambda i, j: (0, j)),       # b1 value slab
                pl.BlockSpec((1, th_eff), lambda i, j: (0, j)),       # b1 gate slab
                pl.BlockSpec((th_eff, d_pad), lambda i, j: (j, 0)),   # W2 slab
                pl.BlockSpec((1, d_pad), lambda i, j: (0, 0)),        # b2
            ],
            out_specs=pl.BlockSpec((tm_eff, d_pad), lambda i, j: (i, 0)),
            scratch_shapes=scratch_shapes,
        ),
        compiler_params=pltpu.CompilerParams(
            dimension_semantics=("parallel", "arbitrary"),
            vmem_limit_bytes=vmem_limit,
        ),
    )(x2d, params["gamma"], params["beta"], params["w1v"], params["w1g"],
      params["b1v"], params["b1g"], params["w2"], params["b2"])

    return out2d[:M, :D].reshape(*lead, D)


# ----------------------------------------------------------------------------- reference


def feed_forward_ref(x, gamma, beta, w1, b1, w2, b2):
    """Pure-JAX reference of the PyTorch module's forward (eval mode)."""
    xf = x.astype(jnp.float32)
    mean = jnp.mean(xf, axis=-1, keepdims=True)
    var = jnp.mean((xf - mean) ** 2, axis=-1, keepdims=True)
    xn = (xf - mean) / jnp.sqrt(var + 1e-5) * gamma + beta
    proj = xn @ w1 + b1
    H = w2.shape[0]
    val, gates = proj[..., :H], proj[..., H:]
    h = val * (0.5 * gates * (1.0 + lax.erf(gates / jnp.sqrt(2.0))))
    return (h @ w2 + b2).astype(x.dtype)


if __name__ == "__main__":
    # Small shapes consistent with the module: tokens of dimension `dim`, mult=2.
    B, S, dim, mult = 2, 8, 32, 2
    H = dim * mult

    key = jax.random.PRNGKey(0)
    kx, kw1, kb1, kw2, kb2 = jax.random.split(key, 5)

    x = jax.random.normal(kx, (B, S, dim), dtype=jnp.float32)

    # Deterministic parameter init (shapes from nn.LayerNorm / nn.Linear).
    gamma = jnp.ones((dim,), jnp.float32)
    beta = jnp.zeros((dim,), jnp.float32)
    w1 = jax.random.normal(kw1, (dim, 2 * H), dtype=jnp.float32) * 0.05
    b1 = jax.random.normal(kb1, (2 * H,), dtype=jnp.float32) * 0.01
    w2 = jax.random.normal(kw2, (H, dim), dtype=jnp.float32) * 0.05
    b2 = jax.random.normal(kb2, (dim,), dtype=jnp.float32) * 0.01

    ref = feed_forward_ref(x, gamma, beta, w1, b1, w2, b2)

    # f32 weights: pad/split once, tight numerical check.
    params_f32 = prepare_feed_forward_params(gamma, beta, w1, b1, w2, b2)
    out = jax.block_until_ready(feed_forward_pallas(x, params_f32))
    assert out.shape == (B, S, dim)
    assert jnp.allclose(out, ref, atol=2e-5, rtol=2e-5)

    # bf16 weight path (halves weight HBM traffic, full MXU rate); looser check.
    params_bf16 = prepare_feed_forward_params(gamma, beta, w1, b1, w2, b2,
                                              weight_dtype=jnp.bfloat16)
    out_bf16 = jax.block_until_ready(feed_forward_pallas(x, params_bf16))
    assert out_bf16.shape == (B, S, dim)
    assert bool(jnp.all(jnp.isfinite(out_bf16)))
    assert jnp.allclose(out_bf16, ref, atol=5e-2, rtol=5e-2)

    # TODO(synk): nn.Dropout is omitted (p=0.0 / eval mode => identity).
    print("KERNEL_OK")
</pallas_src>

<mosaic_0001>
module attributes {stable_mosaic.version = 11 : i64} {
  func.func @_ff_kernel(%arg0: i32, %arg1: i32, %arg2: memref<16x128xf32, #tpu.memory_space<vmem>>, %arg3: memref<1x128xf32, #tpu.memory_space<vmem>>, %arg4: memref<1x128xf32, #tpu.memory_space<vmem>>, %arg5: memref<128x128xf32, #tpu.memory_space<vmem>>, %arg6: memref<128x128xf32, #tpu.memory_space<vmem>>, %arg7: memref<1x128xf32, #tpu.memory_space<vmem>>, %arg8: memref<1x128xf32, #tpu.memory_space<vmem>>, %arg9: memref<128x128xf32, #tpu.memory_space<vmem>>, %arg10: memref<1x128xf32, #tpu.memory_space<vmem>>, %arg11: memref<16x128xf32, #tpu.memory_space<vmem>>) attributes {dimension_semantics = [#tpu.dimension_semantics<parallel>, #tpu.dimension_semantics<arbitrary>], iteration_bounds = array<i64: 1, 1>, scalar_prefetch = 0 : i64, scratch_operands = 0 : i64, tpu.core_type = #tpu.core_type<tc>, window_params = [{transform_indices = @transform_0, window_bounds = array<i64: 16, 128>}, {pipeline_mode = #tpu.pipeline_mode<synchronous>, transform_indices = @transform_1, window_bounds = array<i64: 1, 128>}, {pipeline_mode = #tpu.pipeline_mode<synchronous>, transform_indices = @transform_2, window_bounds = array<i64: 1, 128>}, {transform_indices = @transform_3, window_bounds = array<i64: 128, 128>}, {transform_indices = @transform_4, window_bounds = array<i64: 128, 128>}, {transform_indices = @transform_5, window_bounds = array<i64: 1, 128>}, {transform_indices = @transform_6, window_bounds = array<i64: 1, 128>}, {transform_indices = @transform_7, window_bounds = array<i64: 128, 128>}, {pipeline_mode = #tpu.pipeline_mode<synchronous>, transform_indices = @transform_8, window_bounds = array<i64: 1, 128>}, {transform_indices = @transform_9, window_bounds = array<i64: 16, 128>}]} {
    %c0 = arith.constant 0 : index
    %c0_0 = arith.constant 0 : index
    %0 = vector.load %arg2[%c0, %c0_0] : memref<16x128xf32, #tpu.memory_space<vmem>>, vector<16x128xf32>
    %cst = arith.constant dense<0.000000e+00> : vector<16xf32>
    %1 = vector.multi_reduction <add>, %0, %cst [1] : vector<16x128xf32> to vector<16xf32>
    %2 = vector.shape_cast %1 : vector<16xf32> to vector<16x1xf32>
    %cst_1 = arith.constant 3.125000e-02 : f32
    %3 = vector.broadcast %cst_1 : f32 to vector<16x1xf32>
    %4 = arith.mulf %2, %3 : vector<16x1xf32>
    %5 = vector.broadcast %4 : vector<16x1xf32> to vector<16x128xf32>
    %6 = arith.subf %0, %5 : vector<16x128xf32>
    %7 = tpu.iota {dimensions = array<i32: 1>} : vector<16x128xi32>
    %c32_i32 = arith.constant 32 : i32
    %8 = vector.broadcast %c32_i32 : i32 to vector<16x128xi32>
    %9 = arith.cmpi slt, %7, %8 : vector<16x128xi32>
    %cst_2 = arith.constant 0.000000e+00 : f32
    %10 = vector.broadcast %cst_2 : f32 to vector<16x128xf32>
    %11 = arith.select %9, %6, %10 : vector<16x128xi1>, vector<16x128xf32>
    %12 = arith.mulf %11, %11 : vector<16x128xf32>
    %cst_3 = arith.constant dense<0.000000e+00> : vector<16xf32>
    %13 = vector.multi_reduction <add>, %12, %cst_3 [1] : vector<16x128xf32> to vector<16xf32>
    %14 = vector.shape_cast %13 : vector<16xf32> to vector<16x1xf32>
    %cst_4 = arith.constant 3.125000e-02 : f32
    %15 = vector.broadcast %cst_4 : f32 to vector<16x1xf32>
    %16 = arith.mulf %14, %15 : vector<16x1xf32>
    %cst_5 = arith.constant 9.99999974E-6 : f32
    %17 = vector.broadcast %cst_5 : f32 to vector<16x1xf32>
    %18 = arith.addf %16, %17 : vector<16x1xf32>
    %19 = math.rsqrt %18 : vector<16x1xf32>
    %20 = vector.broadcast %19 : vector<16x1xf32> to vector<16x128xf32>
    %21 = arith.mulf %11, %20 : vector<16x128xf32>
    %c0_6 = arith.constant 0 : index
    %c0_7 = arith.constant 0 : index
    %22 = vector.load %arg3[%c0_6, %c0_7] : memref<1x128xf32, #tpu.memory_space<vmem>>, vector<1x128xf32>
    %23 = vector.broadcast %22 : vector<1x128xf32> to vector<16x128xf32>
    %24 = arith.mulf %21, %23 : vector<16x128xf32>
    %c0_8 = arith.constant 0 : index
    %c0_9 = arith.constant 0 : index
    %25 = vector.load %arg4[%c0_8, %c0_9] : memref<1x128xf32, #tpu.memory_space<vmem>>, vector<1x128xf32>
    %26 = vector.broadcast %25 : vector<1x128xf32> to vector<16x128xf32>
    %27 = arith.addf %24, %26 : vector<16x128xf32>
    %c0_10 = arith.constant 0 : index
    %c0_11 = arith.constant 0 : index
    %28 = vector.load %arg5[%c0_10, %c0_11] : memref<128x128xf32, #tpu.memory_space<vmem>>, vector<128x128xf32>
    %cst_12 = arith.constant dense<0.000000e+00> : vector<16x128xf32>
    %29 = tpu.matmul %27, %28, %cst_12 {dimension_numbers = #tpu.dot_dimension_numbers<[1], [0], [0], [1], [0, 0, 1, 1], [], []>} : vector<16x128xf32>, vector<128x128xf32>, vector<16x128xf32> -> vector<16x128xf32>
    %c0_13 = arith.constant 0 : index
    %c0_14 = arith.constant 0 : index
    %30 = vector.load %arg7[%c0_13, %c0_14] : memref<1x128xf32, #tpu.memory_space<vmem>>, vector<1x128xf32>
    %31 = vector.broadcast %30 : vector<1x128xf32> to vector<16x128xf32>
    %32 = arith.addf %29, %31 : vector<16x128xf32>
    %c0_15 = arith.constant 0 : index
    %c0_16 = arith.constant 0 : index
    %33 = vector.load %arg6[%c0_15, %c0_16] : memref<128x128xf32, #tpu.memory_space<vmem>>, vector<128x128xf32>
    %cst_17 = arith.constant dense<0.000000e+00> : vector<16x128xf32>
    %34 = tpu.matmul %27, %33, %cst_17 {dimension_numbers = #tpu.dot_dimension_numbers<[1], [0], [0], [1], [0, 0, 1, 1], [], []>} : vector<16x128xf32>, vector<128x128xf32>, vector<16x128xf32> -> vector<16x128xf32>
    %c0_18 = arith.constant 0 : index
    %c0_19 = arith.constant 0 : index
    %35 = vector.load %arg8[%c0_18, %c0_19] : memref<1x128xf32, #tpu.memory_space<vmem>>, vector<1x128xf32>
    %36 = vector.broadcast %35 : vector<1x128xf32> to vector<16x128xf32>
    %37 = arith.addf %34, %36 : vector<16x128xf32>
    %cst_20 = arith.constant 5.000000e-01 : f32
    %38 = vector.broadcast %cst_20 : f32 to vector<16x128xf32>
    %39 = arith.mulf %38, %37 : vector<16x128xf32>
    %cst_21 = arith.constant 0.707106769 : f32
    %40 = vector.broadcast %cst_21 : f32 to vector<16x128xf32>
    %41 = arith.mulf %37, %40 : vector<16x128xf32>
    %42 = math.erf %41 : vector<16x128xf32>
    %cst_22 = arith.constant 1.000000e+00 : f32
    %43 = vector.broadcast %cst_22 : f32 to vector<16x128xf32>
    %44 = arith.addf %43, %42 : vector<16x128xf32>
    %45 = arith.mulf %39, %44 : vector<16x128xf32>
    %46 = arith.mulf %32, %45 : vector<16x128xf32>
    %c0_23 = arith.constant 0 : index
    %c0_24 = arith.constant 0 : index
    %47 = vector.load %arg9[%c0_23, %c0_24] : memref<128x128xf32, #tpu.memory_space<vmem>>, vector<128x128xf32>
    %cst_25 = arith.constant dense<0.000000e+00> : vector<16x128xf32>
    %48 = tpu.matmul %46, %47, %cst_25 {dimension_numbers = #tpu.dot_dimension_numbers<[1], [0], [0], [1], [0, 0, 1, 1], [], []>} : vector<16x128xf32>, vector<128x128xf32>, vector<16x128xf32> -> vector<16x128xf32>
    %c0_26 = arith.constant 0 : index
    %c0_27 = arith.constant 0 : index
    %49 = vector.load %arg10[%c0_26, %c0_27] : memref<1x128xf32, #tpu.memory_space<vmem>>, vector<1x128xf32>
    %50 = vector.broadcast %49 : vector<1x128xf32> to vector<16x128xf32>
    %51 = arith.addf %48, %50 : vector<16x128xf32>
    %c0_28 = arith.constant 0 : index
    %c0_29 = arith.constant 0 : index
    %52 = vector.load %arg11[%c0_28, %c0_29] : memref<16x128xf32, #tpu.memory_space<vmem>>, vector<16x128xf32>
    tpu.vector_store %arg11[%c0_28, %c0_29], %51 {strides = array<i32>} : memref<16x128xf32, #tpu.memory_space<vmem>>, vector<16x128xf32>,
    return
  }
  func.func @transform_0(%arg0: i32, %arg1: i32) -> (i32, i32) {
    %c0_i32 = arith.constant 0 : i32
    %c0_i32_0 = arith.constant 0 : i32
    return %arg0, %c0_i32 : i32, i32
  }
  func.func @transform_1(%arg0: i32, %arg1: i32) -> (i32, i32) {
    %c0_i32 = arith.constant 0 : i32
    %c0_i32_0 = arith.constant 0 : i32
    %c0_i32_1 = arith.constant 0 : i32
    return %c0_i32, %c0_i32_0 : i32, i32
  }
  func.func @transform_2(%arg0: i32, %arg1: i32) -> (i32, i32) {
    %c0_i32 = arith.constant 0 : i32
    %c0_i32_0 = arith.constant 0 : i32
    %c0_i32_1 = arith.constant 0 : i32
    return %c0_i32, %c0_i32_0 : i32, i32
  }
  func.func @transform_3(%arg0: i32, %arg1: i32) -> (i32, i32) {
    %c0_i32 = arith.constant 0 : i32
    %c0_i32_0 = arith.constant 0 : i32
    return %c0_i32, %arg1 : i32, i32
  }
  func.func @transform_4(%arg0: i32, %arg1: i32) -> (i32, i32) {
    %c0_i32 = arith.constant 0 : i32
    %c0_i32_0 = arith.constant 0 : i32
    return %c0_i32, %arg1 : i32, i32
  }
  func.func @transform_5(%arg0: i32, %arg1: i32) -> (i32, i32) {
    %c0_i32 = arith.constant 0 : i32
    %c0_i32_0 = arith.constant 0 : i32
    return %c0_i32, %arg1 : i32, i32
  }
  func.func @transform_6(%arg0: i32, %arg1: i32) -> (i32, i32) {
    %c0_i32 = arith.constant 0 : i32
    %c0_i32_0 = arith.constant 0 : i32
    return %c0_i32, %arg1 : i32, i32
  }
  func.func @transform_7(%arg0: i32, %arg1: i32) -> (i32, i32) {
    %c0_i32 = arith.constant 0 : i32
    %c0_i32_0 = arith.constant 0 : i32
    return %arg1, %c0_i32 : i32, i32
  }
  func.func @transform_8(%arg0: i32, %arg1: i32) -> (i32, i32) {
    %c0_i32 = arith.constant 0 : i32
    %c0_i32_0 = arith.constant 0 : i32
    %c0_i32_1 = arith.constant 0 : i32
    return %c0_i32, %c0_i32_0 : i32, i32
  }
  func.func @transform_9(%arg0: i32, %arg1: i32) -> (i32, i32) {
    %c0_i32 = arith.constant 0 : i32
    %c0_i32_0 = arith.constant 0 : i32
    return %arg0, %c0_i32 : i32, i32
  }
}

</mosaic_0001>

<bundles_post_ra>
// kernel: tpu_custom_call.1
= control target key start
LH: loop header
LB: loop body
LE: loop exit
PB: predicated region body
PF: predicated region fallthrough
CT: control target
= control target key end

     0   :  { %14 = vsyncpa [#allocation3], 0  ;;  %s732_s0 = inlined_call_operand.hbm [shape: f32[16,128], index: 0, kind: input, shape index: {}]   ;;  %s733_s1 = inlined_call_operand.hbm [shape: f32[1,128], index: 1, kind: input, shape index: {}]   ;;  %s734_s2 = inlined_call_operand.vmem [shape: f32[1,128], index: 2, kind: input, shape index: {}]   ;;  %s735_s3 = inlined_call_operand.hbm [shape: f32[128,128], index: 3, kind: input, shape index: {}]   ;;  %s736_s4 = inlined_call_operand.hbm [shape: f32[128,128], index: 4, kind: input, shape index: {}]   ;;  %s737_s5 = inlined_call_operand.vmem [shape: f32[1,128], index: 5, kind: input, shape index: {}]   ;;  %s738_s6 = inlined_call_operand.vmem [shape: f32[1,128], index: 6, kind: input, shape index: {}]   ;;  %s739_s7 = inlined_call_operand.hbm [shape: f32[128,128], index: 7, kind: input, shape index: {}]   ;;  %s740_s8 = inlined_call_operand.vmem [shape: f32[1,128], index: 8, kind: input, shape index: {}]   ;;  %s741_s9 = inlined_call_operand.hbm [shape: f32[16,128], index: 9, kind: output, shape index: {}]  }
   0x1   :  { %15 = vsyncpa [#allocation6], 0 }
   0x2   :  { %16 = vsyncpa [#allocation9], 0  ;;  %s36_s11 = sshll.u32 %s733_s1, 4  ;;  %s37_s11 = int_to_ptr.hbm [resolvable:$true] %s36_s11 }
   0x3   :  { %17 = vsyncpa [#allocation4], 0  ;;  %s601_s12 = smov [#allocation5]   ;;  %s61_s16 = sshll.u32 %s736_s4, 4  ;;  %s62_s16 = int_to_ptr.hbm [resolvable:$true] %s61_s16 }
   0x4   :  { %s38_s13 = sshll.u32 %s601_s12, 4  ;;  %s602_s17 = smov [#allocation8]   ;;  %s39_s13 = int_to_ptr.vmem [resolvable:$true] %s38_s13 }
   0x5   :  { %41 = dma.hbm_to_vmem [thread:$0]  %s37_s11, 16, %s39_s13, [#allocation6]  }
   0x6   :  { %s63_s18 = sshll.u32 %s602_s17, 4  ;;  %s22_s21 = sshll.u32 %s732_s0, 4  ;;  %s64_s18 = int_to_ptr.vmem [resolvable:$true] %s63_s18  ;;  %s23_s21 = int_to_ptr.hbm [resolvable:$true] %s22_s21 }
   0x7   :  { %s603_s1 = smov 128   ;;  %s604_s22 = smov 8  }
   0x8   :  { %69 = dma.hbm_to_vmem [thread:$0]  %s62_s16, 2048, %s64_s18, [#allocation9], %s603_s1, %s603_s1, %s604_s22  }
   0x9   :  { %s48_s25 = sshll.u32 %s735_s3, 4  ;;  %s605_s4 = smov [#allocation2]   ;;  %s49_s25 = int_to_ptr.hbm [resolvable:$true] %s48_s25 }
   0xa   :  { %s24_s26 = sshll.u32 %s605_s4, 4  ;;  %s606_s0 = smov [#allocation7]   ;;  %s25_s26 = int_to_ptr.vmem [resolvable:$true] %s24_s26 }
   0xb   :  { %30 = dma.hbm_to_vmem [thread:$0]  %s23_s21, 256, %s25_s26, [#allocation3], %s603_s1, %s603_s1, %s604_s22  }
   0xc   :  { %s50_s27 = sshll.u32 %s606_s0, 4  ;;  %s78_s30 = sshll.u32 %s739_s7, 4  ;;  %s51_s27 = int_to_ptr.vmem [resolvable:$true] %s50_s27  ;;  %s79_s30 = int_to_ptr.hbm [resolvable:$true] %s78_s30 }
   0xd   :  { %56 = dma.hbm_to_vmem [thread:$0]  %s49_s25, 2048, %s51_s27, [#allocation6], %s603_s1, %s603_s1, %s604_s22  }
   0xe   :  { %s607_s3 = smov [#allocation10]  }
   0xf   :  { %s80_s10 = sshll.u32 %s607_s3, 4  ;;  %s81_s10 = int_to_ptr.vmem [resolvable:$true] %s80_s10 }
  0x10   :  { %86 = dma.hbm_to_vmem [thread:$0]  %s79_s30, 2048, %s81_s10, [#allocation9], %s603_s1, %s603_s1, %s604_s22  }
  0x11   :  { %593 = dma.done.wait [#allocation3], 256  }
  0x12   :  { %594 = vsyncadd [#allocation3], 4294967040 }
  0x13   :  { %595 = dma.done.wait [#allocation6], 2064  }
  0x14   :  { %596 = vsyncadd [#allocation6], 4294965232 }
  0x15   :  { %597 = dma.done.wait [#allocation9], 4096  }
  0x16   :  { %598 = vsyncadd [#allocation9], 4294963200  ;;  %v109_v0 = vld [vmem:[#allocation2] sm:$0xff]  ;;  %v110_v1 = vld [vmem:[#allocation2 + $0x8] sm:$0xff]  ;;  %v119_v6 = vlaneseq  ;;  %s608_s15 = smov [#allocation11]   ;;  %s395_s19 = sshll.u32 %s741_s9, 4  ;;  %s396_s19 = int_to_ptr.hbm [resolvable:$true] %s395_s19 }
  0x17   :  { %111 = vadd.xlane.f32.xlu0 %v109_v0  ;;  %v183_v2 = vld [vmem:[#allocation7 + $0x78] sm:$0xff]  ;;  %v182_v4 = vld [vmem:[#allocation7 + $0x70] sm:$0xff]  ;;  %v181_v18 = vld [vmem:[#allocation7 + $0x68] sm:$0xff]  ;;  %s393_s16 = sshll.u32 %s608_s15, 4  ;;  %s394_s16 = int_to_ptr.vmem [resolvable:$true] %s393_s16 }
  0x18   :  { %v226_v3 = vld [vmem:[#allocation8 + $0x78] sm:$0xff]  ;;  %188 = vmatpush.msra.mxu0 %v183_v2  ;;  %v225_v5 = vld [vmem:[#allocation8 + $0x70] sm:$0xff]  ;;  %412 = vmatpush.msra.mxu3 %v183_v2  ;;  %v120_v7 = vand.u32 127, %v119_v6  ;;  %v224_v19 = vld [vmem:[#allocation8 + $0x68] sm:$0xff] }
  0x19   :  { %231 = vmatpush.msra.mxu1 %v226_v3  ;;  %v180_v20 = vld [vmem:[#allocation7 + $0x60] sm:$0xff]  ;;  %v179_v22 = vld [vmem:[#allocation7 + $0x58] sm:$0xff]  ;;  %v178_v24 = vld [vmem:[#allocation7 + $0x50] sm:$0xff] }
  0x1a   :  { %189 = vmatpush.msra.mxu0 %v182_v4  ;;  %413 = vmatpush.msra.mxu3 %v182_v4  ;;  %vm121_vm0 = vcmp.lt.s32.totalorder %v120_v7, 32  ;;  %v223_v21 = vld [vmem:[#allocation8 + $0x60] sm:$0xff]  ;;  %v222_v23 = vld [vmem:[#allocation8 + $0x58] sm:$0xff]  ;;  %v221_v25 = vld [vmem:[#allocation8 + $0x50] sm:$0xff] }
  0x1b   :  { %232 = vmatpush.msra.mxu1 %v225_v5  ;;  %v177_v26 = vld [vmem:[#allocation7 + $0x48] sm:$0xff]  ;;  %v176_v28 = vld [vmem:[#allocation7 + $0x40] sm:$0xff]  ;;  %v175_v30 = vld [vmem:[#allocation7 + $0x38] sm:$0xff] }
  0x1c   :  { %190 = vmatpush.msra.mxu0 %v181_v18  ;;  %414 = vmatpush.msra.mxu3 %v181_v18  ;;  %v220_v27 = vld [vmem:[#allocation8 + $0x48] sm:$0xff]  ;;  %v219_v29 = vld [vmem:[#allocation8 + $0x40] sm:$0xff]  ;;  %v218_v31 = vld [vmem:[#allocation8 + $0x38] sm:$0xff] }
  0x1d   :  { %233 = vmatpush.msra.mxu1 %v224_v19  ;;  %v174_v32 = vld [vmem:[#allocation7 + $0x30] sm:$0xff]  ;;  %v173_v34 = vld [vmem:[#allocation7 + $0x28] sm:$0xff]  ;;  %v172_v36 = vld [vmem:[#allocation7 + $0x20] sm:$0xff] }
  0x1e   :  { %191 = vmatpush.msra.mxu0 %v180_v20  ;;  %415 = vmatpush.msra.mxu3 %v180_v20  ;;  %v217_v33 = vld [vmem:[#allocation8 + $0x30] sm:$0xff]  ;;  %v216_v35 = vld [vmem:[#allocation8 + $0x28] sm:$0xff]  ;;  %v215_v37 = vld [vmem:[#allocation8 + $0x20] sm:$0xff] }
  0x1f   :  { %113 = vadd.xlane.f32.xlu0 %v110_v1  ;;  %234 = vmatpush.msra.mxu1 %v223_v21  ;;  %v171_v38 = vld [vmem:[#allocation7 + $0x18] sm:$0xff]  ;;  %v170_v40 = vld [vmem:[#allocation7 + $0x10] sm:$0xff]  ;;  %v169_v42 = vld [vmem:[#allocation7 + $0x8] sm:$0xff] }
  0x20   :  { %192 = vmatpush.msra.mxu0 %v179_v22  ;;  %416 = vmatpush.msra.mxu3 %v179_v22  ;;  %v214_v39 = vld [vmem:[#allocation8 + $0x18] sm:$0xff]  ;;  %v213_v41 = vld [vmem:[#allocation8 + $0x10] sm:$0xff]  ;;  %v212_v43 = vld [vmem:[#allocation8 + $0x8] sm:$0xff] }
  0x21   :  { %235 = vmatpush.msra.mxu1 %v222_v23  ;;  %v168_v44 = vld [vmem:[#allocation7] sm:$0xff]  ;;  %v436_v60 = vld [vmem:[#allocation5] ss:$0 sm:$0xff]  ;;  %v353_v20 = vld [vmem:[#allocation10 + $0x48] sm:$0xff] }
  0x22   :  { %193 = vmatpush.msra.mxu0 %v178_v24  ;;  %417 = vmatpush.msra.mxu3 %v178_v24  ;;  %v211_v45 = vld [vmem:[#allocation8] sm:$0xff]  ;;  %v351_v23 = vld [vmem:[#allocation10 + $0x38] sm:$0xff] }
  0x23   :  { %236 = vmatpush.msra.mxu1 %v221_v25  ;;  %v352_v22 = vld [vmem:[#allocation10 + $0x40] sm:$0xff] }
  0x24   :  { %194 = vmatpush.msra.mxu0 %v177_v26  ;;  %418 = vmatpush.msra.mxu3 %v177_v26  ;;  %v350_v26 = vld [vmem:[#allocation10 + $0x30] sm:$0xff] }
  0x25   :  { %237 = vmatpush.msra.mxu1 %v220_v27 }
  0x26   :  { %195 = vmatpush.msra.mxu0 %v176_v28  ;;  %419 = vmatpush.msra.mxu3 %v176_v28 }
  0x27   :  { %238 = vmatpush.msra.mxu1 %v219_v29 }
  0x28   :  { %196 = vmatpush.msra.mxu0 %v175_v30  ;;  %420 = vmatpush.msra.mxu3 %v175_v30  ;;  %v349_v30 = vld [vmem:[#allocation10 + $0x28] sm:$0xff] }
  0x29   :  { %239 = vmatpush.msra.mxu1 %v218_v31 }
  0x2a   :  { %197 = vmatpush.msra.mxu0 %v174_v32  ;;  %421 = vmatpush.msra.mxu3 %v174_v32 }
  0x2b   :  { %240 = vmatpush.msra.mxu1 %v217_v33  ;;  %v348_v33 = vld [vmem:[#allocation10 + $0x20] sm:$0xff] }
  0x2c   :  { %198 = vmatpush.msra.mxu0 %v173_v34  ;;  %422 = vmatpush.msra.mxu3 %v173_v34 }
  0x2d   :  { %241 = vmatpush.msra.mxu1 %v216_v35 }
  0x2e   :  { %199 = vmatpush.msra.mxu0 %v172_v36  ;;  %423 = vmatpush.msra.mxu3 %v172_v36 }
  0x2f   :  { %242 = vmatpush.msra.mxu1 %v215_v37  ;;  %v347_v37 = vld [vmem:[#allocation10 + $0x18] sm:$0xff] }
  0x30   :  { %200 = vmatpush.msra.mxu0 %v171_v38  ;;  %424 = vmatpush.msra.mxu3 %v171_v38 }
  0x31   :  { %243 = vmatpush.msra.mxu1 %v214_v39 }
  0x32   :  { %201 = vmatpush.msra.mxu0 %v170_v40  ;;  %425 = vmatpush.msra.mxu3 %v170_v40  ;;  %v346_v40 = vld [vmem:[#allocation10 + $0x10] sm:$0xff] }
  0x33   :  { %244 = vmatpush.msra.mxu1 %v213_v41 }
  0x34   :  { %202 = vmatpush.msra.mxu0 %v169_v42  ;;  %426 = vmatpush.msra.mxu3 %v169_v42 }
  0x35   :  { %245 = vmatpush.msra.mxu1 %v212_v43 }
  0x36   :  { %203 = vmatpush.msra.mxu0 %v168_v44  ;;  %427 = vmatpush.msra.mxu3 %v168_v44 }
  0x37   :  { %246 = vmatpush.msra.mxu1 %v211_v45  ;;  %v345_v45 = vld [vmem:[#allocation10 + $0x8] sm:$0xff] }
  0x8a   :  { %v112_v8 = vpop.xlane.xlu0 %111 }
  0x8b   :  { %v115_v9 = vmul.f32 0.03125, %v112_v8 }
  0x8d   :  { %v117_v10 = vsub.f32 %v109_v0, %v115_v9  ;;  %v437_v0 = vld [vmem:[%s734_s2] ss:$0 sm:$0xff] }
  0x8f   :  { %v686_v11 = vsel %vm121_vm0, %v117_v10, 0.0  ;;  %v359_v10 = vld [vmem:[#allocation10 + $0x78] sm:$0xff] }
  0x90   :  { %v124_v12 = vmul.f32 %v686_v11, %v686_v11  ;;  %364 = vmatpush.msra.mxu2 %v359_v10 }
  0x92   :  { %126 = vadd.xlane.f32.xlu1 %v124_v12  ;;  %v114_v13 = vpop.xlane.xlu0 %113  ;;  %v357_v12 = vld [vmem:[#allocation10 + $0x68] sm:$0xff] }
  0x93   :  { %v116_v14 = vmul.f32 0.03125, %v114_v13  ;;  %v439_v13 = vld [vmem:[%s738_s6] ss:$0 sm:$0xff] }
  0x95   :  { %v118_v15 = vsub.f32 %v110_v1, %v116_v14  ;;  %v356_v14 = vld [vmem:[#allocation10 + $0x60] sm:$0xff] }
  0x97   :  { %v690_v16 = vsel %vm121_vm0, %v118_v15, 0.0 }
  0x98   :  { %v125_v17 = vmul.f32 %v690_v16, %v690_v16 }
  0x9a   :  { %128 = vadd.xlane.f32.xlu1 %v125_v17  ;;  %v355_v17 = vld [vmem:[#allocation10 + $0x58] sm:$0xff] }
 0x105   :  { %v127_v46 = vpop.xlane.xlu1 %126 }
 0x106   :  { %v130_v47 = vmul.f32 0.03125, %v127_v46 }
 0x108   :  { %v132_v48 = vadd.f32 1e-05, %v130_v47 }
 0x10a   :  { %441 = vrsqrt.f32 %v132_v48  ;;  %vm140_vm2 = vweird.f32 %v132_v48 }
 0x10d   :  { %v129_v49 = vpop.xlane.xlu1 %128 }
 0x10e   :  { %v131_v50 = vmul.f32 0.03125, %v129_v49  ;;  %v344_v49 = vld [vmem:[#allocation10] sm:$0xff] }
 0x110   :  { %v442_v51 = vpop.eup %441  ;;  %v133_v52 = vadd.f32 1e-05, %v131_v50 }
 0x111   :  { %v135_v53 = vmul.f32 %v442_v51, %v132_v48  ;;  %vm141_vm1 = vweird.f32 %v442_v51 }
 0x112   :  { %443 = vrsqrt.f32 %v133_v52  ;;  %vm142_vm3 = vmor %vm140_vm2, %vm141_vm1  ;;  %vm150_vm5 = vweird.f32 %v133_v52 }
 0x113   :  { %v136_v54 = vmul.f32 %v442_v51, %v135_v53 }
 0x115   :  { %v137_v55 = vmul.f32 0.5, %v136_v54 }
 0x117   :  { %v138_v56 = vsub.f32 1.5, %v137_v55 }
 0x118   :  { %v444_v57 = vpop.eup %443 }
 0x119   :  { %v139_v58 = vmul.f32 %v442_v51, %v138_v56  ;;  %v145_v59 = vmul.f32 %v444_v57, %v133_v52  ;;  %vm151_vm4 = vweird.f32 %v444_v57 }
 0x11a   :  { %vm152_vm6 = vmor %vm150_vm5, %vm151_vm4 }
 0x11b   :  { %v146_v61 = vmul.f32 %v444_v57, %v145_v59  ;;  %v143_v62 = vsel %vm142_vm3, %v442_v51, %v139_v58 }
 0x11c   :  { %v154_v63 = vmul.f32 %v143_v62, %v686_v11  ;;  %v358_v11 = vld [vmem:[#allocation10 + $0x70] sm:$0xff] }
 0x11d   :  { %v147_v1 = vmul.f32 0.5, %v146_v61  ;;  %365 = vmatpush.msra.mxu2 %v358_v11 }
 0x11e   :  { %v160_v2 = vmul.f32 %v436_v60, %v154_v63 }
 0x11f   :  { %v148_v3 = vsub.f32 1.5, %v147_v1  ;;  %366 = vmatpush.msra.mxu2 %v357_v12 }
 0x120   :  { %v166_v4 = vadd.f32 %v437_v0, %v160_v2 }
 0x121   :  { %v149_v5 = vmul.f32 %v444_v57, %v148_v3  ;;  %367 = vmatpush.msra.mxu2 %v356_v14 }
 0x122   :  { %204 = vmatmul.f32.vlgmr.msra.gmra.mxu0 %v166_v4  ;;  %247 = vmatmul.f32.vlgmr.msra.gmra.mxu1 %v166_v4 }
 0x123   :  { %v153_v6 = vsel %vm152_vm6, %v444_v57, %v149_v5  ;;  %368 = vmatpush.msra.mxu2 %v355_v17 }
 0x124   :  { %v155_v7 = vmul.f32 %v153_v6, %v690_v16  ;;  %v354_v16 = vld [vmem:[#allocation10 + $0x50] sm:$0xff] }
 0x125   :  { %369 = vmatpush.msra.mxu2 %v354_v16 }
 0x126   :  { %v161_v8 = vmul.f32 %v436_v60, %v155_v7 }
 0x127   :  { %370 = vmatpush.msra.mxu2 %v353_v20 }
 0x128   :  { %v167_v9 = vadd.f32 %v437_v0, %v161_v8 }
 0x129   :  { %371 = vmatpush.msra.mxu2 %v352_v22 }
 0x12a   :  { %207 = vmatmul.f32.vlgmr.msra.gmra.mxu3 %v167_v9  ;;  %250 = vmatmul.f32.gmra.mxu1 %v167_v9 }
 0x12b   :  { %372 = vmatpush.msra.mxu2 %v351_v23 }
 0x12d   :  { %373 = vmatpush.msra.mxu2 %v350_v26 }
 0x12f   :  { %374 = vmatpush.msra.mxu2 %v349_v30 }
 0x131   :  { %375 = vmatpush.msra.mxu2 %v348_v33 }
 0x133   :  { %376 = vmatpush.msra.mxu2 %v347_v37 }
 0x135   :  { %377 = vmatpush.msra.mxu2 %v346_v40 }
 0x137   :  { %378 = vmatpush.msra.mxu2 %v345_v45 }
 0x139   :  { %379 = vmatpush.msra.mxu2 %v344_v49 }
 0x19f   :  { %v248_v15 = vpop.f32.mrf.mxu1  ;;  %v205_v37 = vpop.f32.mrf.mxu0 }
 0x1a0   :  { %v702_v18 = vadd.f32 %v439_v13, %v248_v15 }
 0x1a2   :  { %v705_v19 = vmul.f32 0.70710677, %v702_v18 }
 0x1a4   :  { %v258_v21 = vmul.f32 %v705_v19, %v705_v19 }
 0x1a6   :  { %v259_v24 = vmin.f32 %v258_v21, 16.0 }
 0x1a7   :  { %v251_v25 = vpop.f32.mrf.mxu1 }
 0x1a8   :  { %v260_v27 = vmul.f32 2.1237322e-06, %v259_v24  ;;  %v709_v28 = vadd.f32 %v439_v13, %v251_v25  ;;  %v271_v29 = vmul.f32 3.8918573e-05, %v259_v24 }
 0x1aa   :  { %v261_v31 = vadd.f32 0.00028619796, %v260_v27  ;;  %v712_v32 = vmul.f32 0.70710677, %v709_v28  ;;  %v272_v34 = vadd.f32 0.001143296, %v271_v29 }
 0x1ac   :  { %v262_v35 = vmul.f32 %v261_v31, %v259_v24  ;;  %v298_v36 = vmul.f32 %v712_v32, %v712_v32  ;;  %v273_v38 = vmul.f32 %v272_v34, %v259_v24 }
 0x1ad   :  { %v208_v49 = vpop.f32.mrf.mxu3 }
 0x1ae   :  { %v299_v39 = vmin.f32 %v298_v36, 16.0  ;;  %v274_v41 = vadd.f32 0.014752088, %v273_v38  ;;  %v263_v42 = vadd.f32 0.0036580483, %v262_v35 }
 0x1af   :  { %v438_v35 = vld [vmem:[%s737_s5] ss:$0 sm:$0xff] }
 0x1b0   :  { %v300_v43 = vmul.f32 2.1237322e-06, %v299_v39  ;;  %v311_v44 = vmul.f32 3.8918573e-05, %v299_v39  ;;  %v275_v46 = vmul.f32 %v274_v41, %v259_v24  ;;  %v264_v51 = vmul.f32 %v263_v42, %v259_v24 }
 0x1b2   :  { %v301_v47 = vadd.f32 0.00028619796, %v300_v43  ;;  %v312_v48 = vadd.f32 0.001143296, %v311_v44  ;;  %v276_v50 = vadd.f32 0.112945676, %v275_v46  ;;  %v206_v43 = vadd.f32 %v438_v35, %v205_v37 }
 0x1b3   :  { %v265_v58 = vadd.f32 0.05243302, %v264_v51 }
 0x1b4   :  { %v302_v52 = vmul.f32 %v301_v47, %v299_v39  ;;  %v313_v53 = vmul.f32 %v312_v48, %v299_v39  ;;  %v277_v54 = vmul.f32 %v276_v50, %v259_v24  ;;  %v255_v50 = vmul.f32 0.5, %v709_v28 }
 0x1b5   :  { %v266_v0 = vmul.f32 %v265_v58, %v259_v24 }
 0x1b6   :  { %v314_v55 = vadd.f32 0.014752088, %v313_v53  ;;  %v303_v56 = vadd.f32 0.0036580483, %v302_v52  ;;  %v278_v57 = vadd.f32 0.4994258, %v277_v54  ;;  %v209_v52 = vadd.f32 %v438_v35, %v208_v49 }
 0x1b7   :  { %v267_v4 = vadd.f32 0.18741608, %v266_v0 }
 0x1b8   :  { %v315_v59 = vmul.f32 %v314_v55, %v299_v39  ;;  %v279_v60 = vmul.f32 %v278_v57, %v259_v24  ;;  %v304_v62 = vmul.f32 %v303_v56, %v299_v39 }
 0x1b9   :  { %v268_v9 = vmul.f32 %v267_v4, %v259_v24 }
 0x1ba   :  { %v316_v61 = vadd.f32 0.112945676, %v315_v59  ;;  %v280_v63 = vadd.f32 1.0, %v279_v60  ;;  %v305_v3 = vadd.f32 0.05243302, %v304_v62 }
 0x1bb   :  { %v269_v14 = vadd.f32 1.1283791, %v268_v9 }
 0x1bc   :  { %v317_v1 = vmul.f32 %v316_v61, %v299_v39  ;;  %445 = vrcp.f32 %v280_v63  ;;  %v306_v8 = vmul.f32 %v305_v3, %v299_v39  ;;  %v292_v13 = vand.u32 2147483648, %v280_v63 }
 0x1bd   :  { %v290_v17 = vand.u32 2147483647, %v280_v63  ;;  %vm286_vm8 = vweird.f32 %v280_v63  ;;  %v270_v25 = vmul.f32 %v269_v14, %v705_v19  ;;  %v254_v19 = vmul.f32 0.5, %v702_v18 }
 0x1be   :  { %v318_v2 = vadd.f32 0.4994258, %v317_v1  ;;  %v307_v12 = vadd.f32 0.18741608, %v306_v8  ;;  %v293_v22 = vor.u32 1.1754944e-38, %v292_v13 }
 0x1bf   :  { %vm291_vm10 = vcmp.eq.f32.partialorder %v290_v17, 8.507059e+37 }
 0x1c0   :  { %v319_v5 = vmul.f32 %v318_v2, %v299_v39  ;;  %v308_v21 = vmul.f32 %v307_v12, %v299_v39 }
 0x1c2   :  { %v320_v6 = vadd.f32 1.0, %v319_v5  ;;  %v446_v7 = vpop.eup %445  ;;  %v309_v31 = vadd.f32 1.1283791, %v308_v21 }
 0x1c3   :  { %v282_v10 = vmul.f32 %v446_v7, %v280_v63  ;;  %vm287_vm7 = vweird.f32 %v446_v7 }
 0x1c4   :  { %447 = vrcp.f32 %v320_v6  ;;  %vm288_vm9 = vmor %vm286_vm8, %vm287_vm7  ;;  %v332_v30 = vand.u32 2147483648, %v320_v6  ;;  %v330_v34 = vand.u32 2147483647, %v320_v6  ;;  %vm326_vm12 = vweird.f32 %v320_v6 }
 0x1c5   :  { %v283_v11 = vsub.f32 1.0, %v282_v10  ;;  %v310_v41 = vmul.f32 %v309_v31, %v712_v32  ;;  %v440_v32 = vld [vmem:[%s740_s8] ss:$0 sm:$0xff] }
 0x1c6   :  { %v333_v40 = vor.u32 1.1754944e-38, %v332_v30  ;;  %vm331_vm14 = vcmp.eq.f32.partialorder %v330_v34, 8.507059e+37 }
 0x1c7   :  { %v284_v15 = vmul.f32 %v446_v7, %v283_v11 }
 0x1c9   :  { %v285_v20 = vadd.f32 %v446_v7, %v284_v15 }
 0x1ca   :  { %v448_v16 = vpop.eup %447 }
 0x1cb   :  { %v322_v23 = vmul.f32 %v448_v16, %v320_v6  ;;  %v289_v26 = vsel %vm288_vm9, %v446_v7, %v285_v20  ;;  %vm327_vm11 = vweird.f32 %v448_v16 }
 0x1cc   :  { %v294_v24 = vsel %vm291_vm10, %v293_v22, %v289_v26  ;;  %vm328_vm13 = vmor %vm326_vm12, %vm327_vm11 }
 0x1cd   :  { %v323_v27 = vsub.f32 1.0, %v322_v23  ;;  %v295_v29 = vmul.f32 %v294_v24, %v270_v25 }
 0x1cf   :  { %v324_v33 = vmul.f32 %v448_v16, %v323_v27  ;;  %v410_v36 = vclamps-f32 %v295_v29, 1.0 }
 0x1d1   :  { %v325_v38 = vadd.f32 %v448_v16, %v324_v33  ;;  %v338_v39 = vadd.f32 1.0, %v410_v36 }
 0x1d3   :  { %v329_v42 = vsel %vm328_vm13, %v448_v16, %v325_v38  ;;  %v340_v44 = vmul.f32 %v338_v39, %v254_v19 }
 0x1d4   :  { %v334_v45 = vsel %vm331_vm14, %v333_v40, %v329_v42 }
 0x1d5   :  { %v335_v46 = vmul.f32 %v334_v45, %v310_v41  ;;  %v342_v47 = vmul.f32 %v340_v44, %v206_v43 }
 0x1d7   :  { %v411_v48 = vclamps-f32 %v335_v46, 1.0  ;;  %380 = vmatmul.f32.vlgmr.msra.gmra.mxu2 %v342_v47 }
 0x1d9   :  { %v339_v51 = vadd.f32 1.0, %v411_v48 }
 0x1db   :  { %v341_v18 = vmul.f32 %v339_v51, %v255_v50 }
 0x1dd   :  { %v343_v53 = vmul.f32 %v341_v18, %v209_v52 }
 0x1df   :  { %383 = vmatmul.f32.gmra.mxu2 %v343_v53 }
 0x25a   :  { %v381_v54 = vpop.f32.mrf.mxu2 }
 0x25b   :  { %v382_v55 = vadd.f32 %v440_v32, %v381_v54 }
 0x25d   :  { %387 = vst [vmem:[#allocation11] sm:$0xff] %v382_v55 }
 0x262   :  { %v384_v56 = vpop.f32.mrf.mxu2 }
 0x263   :  { %v385_v28 = vadd.f32 %v440_v32, %v384_v56 }
 0x265   :  { %388 = vst [vmem:[#allocation11 + $0x8] sm:$0xff] %v385_v28 }
 0x266   :  { %401 = dma.vmem_to_hbm [thread:$0]  %s394_s16, 256, %s396_s19, [#allocation4], %s603_s1, %s603_s1, %s604_s22  }
 0x267   :  { %599 = dma.done.wait [#allocation4], 256  }
 0x268   :  { %600 = vsyncadd [#allocation4], 4294967040 }
 0x269   :  { %406 = vsyncpa [#allocation3], 1 }
 0x26a   :  { %407 = vsyncpa [#allocation6], 1 }
 0x26b   :  { %408 = vsyncpa [#allocation9], 1 }
 0x26c   :  { %409 = vsyncpa [#allocation4], 1 }

</bundles_post_ra>
